<compile_context>
chip_gen: v7x
topology: tpu7x:2x2x1
jax: 0.10.0
libtpu: 0.0.40
codegen_flags: <defaults>
</compile_context>

<pallas_src>
import functools

import jax
import jax.numpy as jnp
from jax import lax
from jax.experimental import pallas as pl
from jax.experimental.pallas import tpu as pltpu

LANE = 128


def _round_up(x, m):
    return (x + m - 1) // m * m


def _mosaic_params(dims, *byte_counts):
    need = 2 * int(sum(byte_counts)) + (4 << 20)
    limit = int(min(max(need, 16 << 20), 40 << 20))   # <=40MiB: headroom on v7x (64MiB)
    return pltpu.CompilerParams(dimension_semantics=dims, vmem_limit_bytes=limit)


# ----------------------- fused 3x3 conv (row-tiled, bf16) ---------------------

def _conv3x3_kernel(x0_ref, x1_ref, x2_ref, w_ref, b_ref, o_ref, *, Wp8, TR):
    i = pl.program_id(1)                    # row-block index (read at top level)
    r0 = i * TR
    xs = (x0_ref, x1_ref, x2_ref)           # column pre-shifted copies (dx = 0,1,2)
    acc = None
    for dy in range(3):
        for dx in range(3):
            start = r0 + dy * Wp8           # TR and Wp8 are multiples of 8 -> aligned
            slab = xs[dx][0, pl.ds(start, TR), :]                    # (TR, Cin) bf16
            d = jnp.dot(slab, w_ref[dy * 3 + dx],
                        preferred_element_type=jnp.float32)
            acc = d if acc is None else acc + d                      # first tap: no init
    o_ref[0] = jnp.maximum(acc + b_ref[...], 0.0).astype(o_ref.dtype)


def conv3x3_relu(x, w9, b, *, TR=128):
    """3x3 'same' conv + ReLU.  x:(B,H,W,Cin) bf16, w9:(9,Cin,Cout) bf16 -> bf16."""
    B, H, W, Cin = x.shape
    Cout = w9.shape[-1]
    Hp, Wp = H + 2, W + 2
    Wp8 = _round_up(Wp, 8)
    nrows = H * Wp8
    Rpad = _round_up(nrows, TR)
    Lin = _round_up(Rpad + 2 * Wp8 + 2, 8)

    xp = jnp.pad(x.astype(jnp.bfloat16), ((0, 0), (1, 1), (1, 1), (0, 0)))
    xp = jnp.pad(xp, ((0, 0), (0, 0), (0, Wp8 - Wp), (0, 0))).reshape(B, Hp * Wp8, Cin)
    xp = jnp.pad(xp, ((0, 0), (0, Lin + 2 - Hp * Wp8), (0, 0)))
    x0 = xp[:, 0:Lin]
    x1 = xp[:, 1:Lin + 1]
    x2 = xp[:, 2:Lin + 2]

    out = pl.pallas_call(
        functools.partial(_conv3x3_kernel, Wp8=Wp8, TR=TR),
        out_shape=jax.ShapeDtypeStruct((B, Rpad, Cout), jnp.bfloat16),
        grid=(B, Rpad // TR),
        in_specs=[
            pl.BlockSpec((1, Lin, Cin), lambda bb, ii: (bb, 0, 0)),
            pl.BlockSpec((1, Lin, Cin), lambda bb, ii: (bb, 0, 0)),
            pl.BlockSpec((1, Lin, Cin), lambda bb, ii: (bb, 0, 0)),
            pl.BlockSpec((9, Cin, Cout), lambda bb, ii: (0, 0, 0)),
            pl.BlockSpec((1, Cout), lambda bb, ii: (0, 0)),
        ],
        out_specs=pl.BlockSpec((1, TR, Cout), lambda bb, ii: (bb, ii, 0)),
        compiler_params=_mosaic_params(("parallel", "parallel"),
                                       3 * Lin * Cin * 2, 9 * Cin * Cout * 2,
                                       2 * TR * Cout * 2),
        cost_estimate=pl.CostEstimate(
            flops=2 * B * Rpad * 9 * Cin * Cout,
            transcendentals=0,
            bytes_accessed=B * (3 * Lin * Cin * 2 + Rpad * Cout * 2) + 9 * Cin * Cout * 2),
    )(x0, x1, x2, w9, b.reshape(1, Cout).astype(jnp.float32))
    # drop padded / garbage columns of the flat-row formulation
    return out[:, :nrows].reshape(B, H, Wp8, Cout)[:, :, :W, :]


# ----------------------- tiled / pipelined dense matmul -----------------------

def _mm_epilogue(acc, bias, col0, epilogue, epi_cols):
    acc = acc + bias
    if epilogue == "relu":
        return jnp.maximum(acc, 0.0)
    if epilogue == "sigmoid_cols":
        col = lax.broadcasted_iota(jnp.int32, acc.shape, 1) + col0
        sig = 1.0 / (1.0 + jnp.exp(-acc))
        return jnp.where(col < epi_cols, sig, acc)
    if epilogue == "softmax_cols":
        col = lax.broadcasted_iota(jnp.int32, acc.shape, 1) + col0
        is_cls = col < epi_cols
        masked = jnp.where(is_cls, acc, -jnp.inf)
        m = jnp.max(masked, axis=-1, keepdims=True)
        e = jnp.where(is_cls, jnp.exp(masked - m), 0.0)
        denom = jnp.maximum(jnp.sum(e, axis=-1, keepdims=True), 1e-30)
        return jnp.where(is_cls, e / denom, acc)
    return acc


def _matmul_kernel_single(x_ref, w_ref, b_ref, o_ref, *, tn, epilogue, epi_cols):
    col0 = pl.program_id(1) * tn
    acc = jnp.dot(x_ref[...], w_ref[...], preferred_element_type=jnp.float32)
    o_ref[...] = _mm_epilogue(acc, b_ref[...], col0, epilogue, epi_cols).astype(o_ref.dtype)


def _matmul_kernel_multi(x_ref, w_ref, b_ref, o_ref, acc_ref, *, tn, epilogue, epi_cols):
    # all program_ids read at top level (never inside a pl.when body)
    j = pl.program_id(1)
    k = pl.program_id(2)
    nk = pl.num_programs(2)
    col0 = j * tn

    @pl.when(k == 0)
    def _init():
        acc_ref[...] = jnp.zeros(acc_ref.shape, acc_ref.dtype)

    acc_ref[...] += jnp.dot(x_ref[...], w_ref[...], preferred_element_type=jnp.float32)

    @pl.when(k == nk - 1)
    def _finalize():
        o_ref[...] = _mm_epilogue(acc_ref[...], b_ref[...], col0,
                                  epilogue, epi_cols).astype(o_ref.dtype)


def pallas_matmul(x, w, b, *, epilogue=None, epi_cols=0, out_dtype=jnp.float32,
                  tm=512, tn=128, tk=512):
    """out = epilogue(x @ w + b); bf16 MXU inputs, f32 accumulation."""
    M, K = x.shape
    N = w.shape[1]
    Mp = _round_up(M, 8)
    tm = min(tm, Mp)
    Mp = _round_up(Mp, tm)
    Np = _round_up(N, LANE)
    tn = min(tn, Np)
    Np = _round_up(Np, tn)
    Kp = _round_up(K, LANE)
    tk = min(tk, Kp)
    Kp = _round_up(Kp, tk)

    xp = jnp.pad(x, ((0, Mp - M), (0, Kp - K))).astype(jnp.bfloat16)
    wp = jnp.pad(w, ((0, Kp - K), (0, Np - N))).astype(jnp.bfloat16)
    bp = jnp.pad(b, (0, Np - N)).reshape(1, Np).astype(jnp.float32)

    cost = pl.CostEstimate(flops=2 * Mp * Np * Kp,
                           transcendentals=Mp * Np if epilogue in ("sigmoid_cols", "softmax_cols") else 0,
                           bytes_accessed=Mp * Kp * 2 + Kp * Np * 2 + Mp * Np * 2)

    if Kp // tk == 1:
        # single-K-tile fast path: no scratch accumulator, no pl.when
        out = pl.pallas_call(
            functools.partial(_matmul_kernel_single, tn=tn,
                              epilogue=epilogue, epi_cols=epi_cols),
            out_shape=jax.ShapeDtypeStruct((Mp, Np), out_dtype),
            grid=(Mp // tm, Np // tn),
            in_specs=[
                pl.BlockSpec((tm, Kp), lambda i, j: (i, 0)),
                pl.BlockSpec((Kp, tn), lambda i, j: (0, j)),
                pl.BlockSpec((1, tn), lambda i, j: (0, j)),
            ],
            out_specs=pl.BlockSpec((tm, tn), lambda i, j: (i, j)),
            compiler_params=_mosaic_params(("parallel", "parallel"),
                                           2 * tm * Kp * 2, 2 * Kp * tn * 2, 2 * tm * tn * 4),
            cost_estimate=cost,
        )(xp, wp, bp)
    else:
        out = pl.pallas_call(
            functools.partial(_matmul_kernel_multi, tn=tn,
                              epilogue=epilogue, epi_cols=epi_cols),
            out_shape=jax.ShapeDtypeStruct((Mp, Np), out_dtype),
            grid=(Mp // tm, Np // tn, Kp // tk),
            in_specs=[
                pl.BlockSpec((tm, tk), lambda i, j, k: (i, k)),
                pl.BlockSpec((tk, tn), lambda i, j, k: (k, j)),
                pl.BlockSpec((1, tn), lambda i, j, k: (0, j)),
            ],
            out_specs=pl.BlockSpec((tm, tn), lambda i, j, k: (i, j)),
            scratch_shapes=[pltpu.VMEM((tm, tn), jnp.float32)],
            compiler_params=_mosaic_params(("parallel", "parallel", "arbitrary"),
                                           2 * tm * tk * 2, 2 * tk * tn * 2,
                                           tm * tn * 4, 2 * tm * tn * 4),
            cost_estimate=cost,
        )(xp, wp, bp)
    return out[:M, :N]


# ------------------- ROI align as a per-image MXU matmul ----------------------

def _roi_align_kernel(w_ref, f_ref, o_ref):
    o_ref[0] = jnp.dot(w_ref[0], f_ref[0],
                       preferred_element_type=jnp.float32).astype(o_ref.dtype)


def pallas_roi_align(base_feat, rows, wts):
    """pooled[b] = Wbilinear[b] @ feat[b]; one contiguous block DMA per input per image.

    base_feat : (B, H, W, C) bf16
    rows      : (B, topN*PP, 4) int32 per-image flat tap rows (y*W + x)
    wts       : (B, topN*PP, 4) f32 bilinear tap weights
    """
    B, H, W, C = base_feat.shape
    NPP = rows.shape[1]
    HW = H * W
    HWp = _round_up(HW, LANE)
    NPPp = _round_up(NPP, 8)

    feat = jnp.pad(base_feat.reshape(B, HW, C).astype(jnp.bfloat16),
                   ((0, 0), (0, HWp - HW), (0, 0)))
    # dense (mostly-zero) bilinear weight matrix; cheap at these sizes.
    # TODO(synk): at production scale switch to a per-ROI row-span DMA gather +
    #             VPU weighted sum instead of the dense matmul.
    oh = jax.nn.one_hot(rows, HWp, dtype=jnp.float32)               # (B, NPP, 4, HWp)
    wd = jnp.einsum("bnt,bnth->bnh", wts, oh)
    wd = jnp.pad(wd, ((0, 0), (0, NPPp - NPP), (0, 0))).astype(jnp.bfloat16)

    out = pl.pallas_call(
        _roi_align_kernel,
        out_shape=jax.ShapeDtypeStruct((B, NPPp, C), jnp.bfloat16),
        grid=(B,),
        in_specs=[
            pl.BlockSpec((1, NPPp, HWp), lambda bb: (bb, 0, 0)),
            pl.BlockSpec((1, HWp, C), lambda bb: (bb, 0, 0)),
        ],
        out_specs=pl.BlockSpec((1, NPPp, C), lambda bb: (bb, 0, 0)),
        compiler_params=_mosaic_params(("parallel",),
                                       2 * NPPp * HWp * 2, 2 * HWp * C * 2,
                                       2 * NPPp * C * 2),
        cost_estimate=pl.CostEstimate(
            flops=2 * B * NPPp * HWp * C, transcendentals=0,
            bytes_accessed=B * (NPPp * HWp * 2 + HWp * C * 2 + NPPp * C * 2)),
    )(wd, feat)
    return out[:, :NPP]


# ------------------------------- JAX glue -------------------------------------

def make_anchors(H, W, feat_stride, scales):
    ys, xs = jnp.meshgrid(jnp.arange(H, dtype=jnp.float32),
                          jnp.arange(W, dtype=jnp.float32), indexing="ij")
    cx = (xs + 0.5) * feat_stride
    cy = (ys + 0.5) * feat_stride
    per_scale = []
    for s in scales:
        half = s / 2.0
        per_scale.append(jnp.stack([cx - half, cy - half, cx + half, cy + half], axis=-1))
    return jnp.stack(per_scale, axis=2).reshape(H * W * len(scales), 4)


def decode_boxes(anchors, deltas):
    w = anchors[:, 2] - anchors[:, 0] + 1.0
    h = anchors[:, 3] - anchors[:, 1] + 1.0
    cx = anchors[:, 0] + 0.5 * w
    cy = anchors[:, 1] + 0.5 * h
    dx, dy, dw, dh = deltas[..., 0], deltas[..., 1], deltas[..., 2], deltas[..., 3]
    pcx = dx * w + cx
    pcy = dy * h + cy
    pw = jnp.exp(dw) * w
    ph = jnp.exp(dh) * h
    return jnp.stack([pcx - 0.5 * pw, pcy - 0.5 * ph,
                      pcx + 0.5 * pw, pcy + 0.5 * ph], axis=-1)


def clip_boxes(boxes, im_info):
    Hm = im_info[:, 0][:, None]
    Wm = im_info[:, 1][:, None]
    x1 = jnp.clip(boxes[..., 0], 0.0, Wm - 1.0)
    y1 = jnp.clip(boxes[..., 1], 0.0, Hm - 1.0)
    x2 = jnp.clip(boxes[..., 2], 0.0, Wm - 1.0)
    y2 = jnp.clip(boxes[..., 3], 0.0, Hm - 1.0)
    return jnp.stack([x1, y1, x2, y2], axis=-1)


def roi_align_tables(props, H, W, pool, spatial_scale):
    """Per-image flat tap rows + bilinear weights (sampling_ratio = 1 tap/bin)."""
    # TODO(synk): torchvision RoIAlign uses an adaptive sampling_ratio; fixed at 1 here.
    B, N, _ = props.shape
    PP = pool * pool
    x1 = props[..., 0] * spatial_scale
    y1 = props[..., 1] * spatial_scale
    x2 = props[..., 2] * spatial_scale
    y2 = props[..., 3] * spatial_scale
    bw = (x2 - x1) / pool
    bh = (y2 - y1) / pool
    centers = jnp.arange(pool, dtype=jnp.float32) + 0.5
    cx = x1[..., None, None] + bw[..., None, None] * centers[None, None, None, :]
    cy = y1[..., None, None] + bh[..., None, None] * centers[None, None, :, None]
    cx = jnp.clip(jnp.broadcast_to(cx, (B, N, pool, pool)), 0.0, W - 1.0)
    cy = jnp.clip(jnp.broadcast_to(cy, (B, N, pool, pool)), 0.0, H - 1.0)
    x0 = jnp.floor(cx)
    y0 = jnp.floor(cy)
    lx = cx - x0
    ly = cy - y0
    x0i = x0.astype(jnp.int32)
    y0i = y0.astype(jnp.int32)
    x1i = jnp.minimum(x0i + 1, W - 1)
    y1i = jnp.minimum(y0i + 1, H - 1)
    w00 = (1.0 - ly) * (1.0 - lx)
    w01 = (1.0 - ly) * lx
    w10 = ly * (1.0 - lx)
    w11 = ly * lx
    rows = jnp.stack([y0i * W + x0i, y0i * W + x1i,
                      y1i * W + x0i, y1i * W + x1i], axis=-1)
    wts = jnp.stack([w00, w01, w10, w11], axis=-1)
    return rows.reshape(B, N * PP, 4), wts.reshape(B, N * PP, 4).astype(jnp.float32)


# -------------------------------- the module ----------------------------------

class FasterRCNNPallas:
    def __init__(self, classes, class_agnostic, *, in_channels=3, dout_base=16,
                 rpn_dim=16, hidden=64, pooling_size=4, feat_stride=1,
                 anchor_scales=(2.0, 4.0, 8.0), post_nms_topN=8, seed=0):
        self.classes = classes
        self.num_classes = len(classes)
        nc = self.num_classes
        self.class_agnostic = class_agnostic
        self.pooling_size = pooling_size
        self.feat_stride = float(feat_stride)
        self.anchor_scales = anchor_scales
        self.A = len(anchor_scales)
        self.post_nms_topN = post_nms_topN
        self.bbox_out = 4 if class_agnostic else 4 * nc

        cbp = _round_up(dout_base, LANE)      # padded backbone channels (lane-dense)
        crp = _round_up(rpn_dim, LANE)        # padded RPN-conv channels
        hp = _round_up(hidden, LANE)          # padded FC width
        self.cbp = cbp

        def normal(key, shape, std):
            return std * jax.random.normal(key, shape, dtype=jnp.float32)

        keys = jax.random.split(jax.random.PRNGKey(seed), 8)

        # RCNN_base: one 3x3 conv + ReLU, run as im2col (K = 9*Cin) matmul
        w = normal(keys[0], (9, in_channels, dout_base), 0.01)
        w = jnp.pad(w, ((0, 0), (0, 0), (0, cbp - dout_base)))
        self.w_base = w.reshape(9 * in_channels, cbp).astype(jnp.bfloat16)
        self.b_base = jnp.zeros((cbp,), jnp.float32)

        # RPN 3x3 conv (fused shifted-slab kernel; one weight slab per tap)
        w = normal(keys[1], (9, dout_base, rpn_dim), 0.01)
        self.w_rpn_conv = jnp.pad(
            w, ((0, 0), (0, cbp - dout_base), (0, crp - rpn_dim))).astype(jnp.bfloat16)
        self.b_rpn_conv = jnp.zeros((crp,), jnp.float32)

        # fused RPN heads: cols [0,A) = (fg - bg) logits (sigmoid -> fg prob),
        #                  cols [A,5A) = bbox deltas.
        # NOTE: if real checkpoint weights are loaded, the fused bias must be
        #       b_fg - b_bg (here both are zero so it is consistent).
        A = self.A
        w_cls = normal(keys[2], (rpn_dim, 2 * A), 0.01)
        w_box = normal(keys[3], (rpn_dim, 4 * A), 0.01)
        w_fg_minus_bg = w_cls[:, 1::2] - w_cls[:, 0::2]
        w_heads = jnp.concatenate([w_fg_minus_bg, w_box], axis=1)       # (rpn_dim, 5A)
        self.w_rpn_heads = jnp.pad(w_heads, ((0, crp - rpn_dim), (0, 0)))
        self.b_rpn_heads = jnp.zeros((5 * A,), jnp.float32)

        # detection head (_head_to_tail: fc1+relu, fc2+relu) + fused cls|bbox predictors
        PP = pooling_size * pooling_size
        w1 = normal(keys[4], (PP, dout_base, hidden), 0.01)
        w1 = jnp.pad(w1, ((0, 0), (0, cbp - dout_base), (0, hp - hidden)))
        self.w_fc1 = w1.reshape(PP * cbp, hp).astype(jnp.bfloat16)
        self.b_fc1 = jnp.zeros((hp,), jnp.float32)
        w2 = normal(keys[5], (hidden, hidden), 0.01)
        self.w_fc2 = jnp.pad(w2, ((0, hp - hidden), (0, hp - hidden))).astype(jnp.bfloat16)
        self.b_fc2 = jnp.zeros((hp,), jnp.float32)
        w_cls2 = normal(keys[6], (hidden, nc), 0.01)
        w_box2 = normal(keys[7], (hidden, self.bbox_out), 0.001)
        wh = jnp.concatenate([w_cls2, w_box2], axis=1)
        wh = jnp.pad(wh, ((0, hp - hidden), (0, hp - (nc + self.bbox_out))))
        self.w_heads = wh.astype(jnp.bfloat16)
        self.b_heads = jnp.zeros((hp,), jnp.float32)

    def forward(self, im_data, im_info, gt_boxes, num_boxes):
        # eval-mode forward: proposal-target layer / losses disabled (training=False)
        del gt_boxes, num_boxes
        B = im_data.shape[0]
        x = jnp.transpose(im_data, (0, 2, 3, 1)).astype(jnp.float32)    # NCHW -> NHWC
        H, W, Cin = x.shape[1], x.shape[2], x.shape[3]                  # feat_stride=1

        # ---- RCNN_base: stem conv as im2col (K=27) + lane-dense matmul ----
        xp = jnp.pad(x, ((0, 0), (1, 1), (1, 1), (0, 0)))
        patches = [xp[:, dy:dy + H, dx:dx + W, :] for dy in range(3) for dx in range(3)]
        im2col = jnp.concatenate(patches, axis=-1).reshape(B * H * W, 9 * Cin)
        base_flat = pallas_matmul(im2col, self.w_base, self.b_base,
                                  epilogue="relu", out_dtype=jnp.bfloat16)
        cbp = base_flat.shape[1]
        base_feat = base_flat.reshape(B, H, W, cbp)                     # bf16, lane-dense

        # ---- RPN ----
        rpn_feat = conv3x3_relu(base_feat, self.w_rpn_conv, self.b_rpn_conv)
        rpn_flat = rpn_feat.reshape(B * H * W, -1)
        A = self.A
        rpn_out = pallas_matmul(rpn_flat, self.w_rpn_heads, self.b_rpn_heads,
                                epilogue="sigmoid_cols", epi_cols=A,
                                out_dtype=jnp.bfloat16).astype(jnp.float32)
        fg_scores = rpn_out[:, :A].reshape(B, H * W * A)
        deltas = rpn_out[:, A:5 * A].reshape(B, H * W * A, 4)

        anchors = make_anchors(H, W, self.feat_stride, self.anchor_scales)
        boxes = clip_boxes(decode_boxes(anchors, deltas), im_info)

        # TODO(synk): RPN proposal NMS has no clean Pallas equivalent; proposals are
        #             selected by plain top-k on the fg score instead.
        _, top_idx = lax.top_k(fg_scores, self.post_nms_topN)
        props = jnp.take_along_axis(boxes, top_idx[..., None], axis=1)
        bcol = jnp.broadcast_to(jnp.arange(B, dtype=jnp.float32)[:, None, None],
                                (B, self.post_nms_topN, 1))
        rois = jnp.concatenate([bcol, props], axis=-1)                  # (B, topN, 5)

        # ---- ROI align (pooling_mode == 'align') ----
        pool = self.pooling_size
        rows, wts = roi_align_tables(props, H, W, pool, 1.0 / self.feat_stride)
        pooled = pallas_roi_align(base_feat, rows, wts)                 # (B, topN*PP, C)
        R = B * self.post_nms_topN
        pooled = pooled.reshape(R, pool * pool * cbp)

        # ---- detection head: fc1 -> fc2 -> cls|bbox with masked softmax ----
        h = pallas_matmul(pooled, self.w_fc1, self.b_fc1,
                          epilogue="relu", out_dtype=jnp.bfloat16, tk=512)
        h = pallas_matmul(h, self.w_fc2, self.b_fc2,
                          epilogue="relu", out_dtype=jnp.bfloat16)
        nc = self.num_classes
        out = pallas_matmul(h, self.w_heads, self.b_heads,
                            epilogue="softmax_cols", epi_cols=nc, out_dtype=jnp.float32)
        cls_prob = out[:, :nc].reshape(B, self.post_nms_topN, nc)
        bbox_pred = out[:, nc:nc + self.bbox_out].reshape(B, self.post_nms_topN,
                                                          self.bbox_out)

        # eval: losses / labels are zeros / None, matching the PyTorch eval branch
        return (rois, cls_prob, bbox_pred, None, 0.0, 0.0, 0.0, 0.0, None)


# ----------------------------------- main --------------------------------------

if __name__ == "__main__":
    key = jax.random.PRNGKey(0)
    B, C, Himg, Wimg = 2, 3, 16, 16
    im_data = jax.random.normal(key, (B, C, Himg, Wimg), dtype=jnp.float32)
    im_info = jnp.tile(jnp.array([[Himg, Wimg, 1.0]], jnp.float32), (B, 1))
    gt_boxes = jnp.zeros((B, 5, 5), jnp.float32)
    num_boxes = jnp.zeros((B,), jnp.int32)

    classes = ("__background__", "car", "person", "bike")
    model = FasterRCNNPallas(classes, class_agnostic=False, in_channels=C,
                             pooling_size=4, feat_stride=1, post_nms_topN=8, seed=0)

    rois, cls_prob, bbox_pred, *_ = model.forward(im_data, im_info, gt_boxes, num_boxes)
    jax.block_until_ready((rois, cls_prob, bbox_pred))

    assert rois.shape == (B, 8, 5)
    assert cls_prob.shape == (B, 8, len(classes))
    assert bbox_pred.shape == (B, 8, 4 * len(classes))
    assert bool(jnp.all(jnp.isfinite(cls_prob))) and bool(jnp.all(jnp.isfinite(bbox_pred)))
    print("KERNEL_OK")
</pallas_src>

<mosaic_0001>
module attributes {stable_mosaic.version = 11 : i64} {
  func.func @_matmul_kernel_single(%arg0: i32, %arg1: i32, %arg2: memref<512x128xbf16, #tpu.memory_space<vmem>>, %arg3: memref<128x128xbf16, #tpu.memory_space<vmem>>, %arg4: memref<1x128xf32, #tpu.memory_space<vmem>>, %arg5: memref<512x128xbf16, #tpu.memory_space<vmem>>) attributes {dimension_semantics = [#tpu.dimension_semantics<parallel>, #tpu.dimension_semantics<parallel>], iteration_bounds = array<i64: 1, 1>, scalar_prefetch = 0 : i64, scratch_operands = 0 : i64, tpu.core_type = #tpu.core_type<tc>, window_params = [{transform_indices = @transform_0, window_bounds = array<i64: 512, 128>}, {transform_indices = @transform_1, window_bounds = array<i64: 128, 128>}, {transform_indices = @transform_2, window_bounds = array<i64: 1, 128>}, {transform_indices = @transform_3, window_bounds = array<i64: 512, 128>}]} {
    %c0 = arith.constant 0 : index
    %c0_0 = arith.constant 0 : index
    %0 = vector.load %arg2[%c0, %c0_0] : memref<512x128xbf16, #tpu.memory_space<vmem>>, vector<512x128xbf16>
    %c0_1 = arith.constant 0 : index
    %c0_2 = arith.constant 0 : index
    %1 = vector.load %arg3[%c0_1, %c0_2] : memref<128x128xbf16, #tpu.memory_space<vmem>>, vector<128x128xbf16>
    %cst = arith.constant dense<0.000000e+00> : vector<512x128xf32>
    %2 = tpu.matmul %0, %1, %cst {dimension_numbers = #tpu.dot_dimension_numbers<[1], [0], [0], [1], [0, 0, 1, 1], [], []>} : vector<512x128xbf16>, vector<128x128xbf16>, vector<512x128xf32> -> vector<512x128xf32>
    %c0_3 = arith.constant 0 : index
    %c0_4 = arith.constant 0 : index
    %3 = vector.load %arg4[%c0_3, %c0_4] : memref<1x128xf32, #tpu.memory_space<vmem>>, vector<1x128xf32>
    %4 = vector.broadcast %3 : vector<1x128xf32> to vector<512x128xf32>
    %5 = arith.addf %2, %4 : vector<512x128xf32>
    %cst_5 = arith.constant 0.000000e+00 : f32
    %6 = vector.broadcast %cst_5 : f32 to vector<512x128xf32>
    %7 = arith.maximumf %5, %6 : vector<512x128xf32>
    %8 = arith.truncf %7 : vector<512x128xf32> to vector<512x128xbf16>
    %c0_6 = arith.constant 0 : index
    %c0_7 = arith.constant 0 : index
    %9 = vector.load %arg5[%c0_6, %c0_7] : memref<512x128xbf16, #tpu.memory_space<vmem>>, vector<512x128xbf16>
    tpu.vector_store %arg5[%c0_6, %c0_7], %8 {strides = array<i32>} : memref<512x128xbf16, #tpu.memory_space<vmem>>, vector<512x128xbf16>,
    return
  }
  func.func @transform_0(%arg0: i32, %arg1: i32) -> (i32, i32) {
    %c0_i32 = arith.constant 0 : i32
    %c0_i32_0 = arith.constant 0 : i32
    return %arg0, %c0_i32 : i32, i32
  }
  func.func @transform_1(%arg0: i32, %arg1: i32) -> (i32, i32) {
    %c0_i32 = arith.constant 0 : i32
    %c0_i32_0 = arith.constant 0 : i32
    return %c0_i32, %arg1 : i32, i32
  }
  func.func @transform_2(%arg0: i32, %arg1: i32) -> (i32, i32) {
    %c0_i32 = arith.constant 0 : i32
    %c0_i32_0 = arith.constant 0 : i32
    return %c0_i32, %arg1 : i32, i32
  }
  func.func @transform_3(%arg0: i32, %arg1: i32) -> (i32, i32) {
    %c0_i32 = arith.constant 0 : i32
    return %arg0, %arg1 : i32, i32
  }
}

</mosaic_0001>

<bundles_post_ra>
// kernel: tpu_custom_call.1
= control target key start
LH: loop header
LB: loop body
LE: loop exit
PB: predicated region body
PF: predicated region fallthrough
CT: control target
= control target key end

     0   :  { %8 = vsyncpa [#allocation3], 0  ;;  %s1814_s0 = inlined_call_operand.hbm [shape: bf16[512,128], index: 0, kind: input, shape index: {}]   ;;  %s1815_s1 = inlined_call_operand.hbm [shape: bf16[128,128], index: 1, kind: input, shape index: {}]   ;;  %s1816_s2 = inlined_call_operand.vmem [shape: f32[1,128], index: 2, kind: input, shape index: {}]   ;;  %s1817_s3 = inlined_call_operand.hbm [shape: bf16[512,128], index: 3, kind: output, shape index: {}]  }
   0x1   :  { %9 = vsyncpa [#allocation6], 0 }
   0x2   :  { %10 = vsyncpa [#allocation4], 0  ;;  %s1675_s12 = smov [#allocation2]   ;;  %s1603_s16 = scalar_lea.hbm %s1814_s0, 4096 }
   0x3   :  { %s16_s13 = sshll.u32 %s1675_s12, 4  ;;  %p1604_p0 = scmp.ne.s32.totalorder %s1814_s0, %s1603_s16  ;;  %s17_s13 = int_to_ptr.vmem [resolvable:$true] %s16_s13 }
   0x4   :  { %p1607_p1 = scmp.lt.u32.totalorder %s1603_s16, %s1814_s0 }
   0x6   :  { %p1609_p2 = pnand %p1607_p1, %p1604_p0 }
   0x8   :  { %1612 = shalt.err (!%p1609_p2)
}
   0x9   :  { %s1613_s21 = scalar_lea.vmem %s17_s13, 4096  ;;  %p1618_p4 = scmp.lt.s32.totalorder %s17_s13, %s17_s13 }
   0xa   :  { %p1614_p3 = scmp.ne.s32.totalorder %s17_s13, %s1613_s21  ;;  %p1619_p5 = scmp.lt.s32.totalorder %s1613_s21, %s1613_s21 }
   0xc   :  { %p1620_p6 = por %p1619_p5, %p1618_p4 }
   0xe   :  { %p1621_p7 = pnand %p1620_p6, %p1614_p3 }
  0x10   :  { %1624 = shalt.err (!%p1621_p7)
}
  0x11   :  { %s1676_s22 = smov 64   ;;  %s1677_s23 = smov 4  }
  0x12   :  { %22 = dma.hbm_to_vmem [thread:$0]  %s1814_s0, 4096, %s17_s13, [#allocation3], %s1676_s22, %s1676_s22, %s1677_s23  }
  0x13   :  { %s1678_s26 = smov [#allocation5]   ;;  %s1625_s30 = scalar_lea.hbm %s1815_s1, 1024 }
  0x14   :  { %s28_s27 = sshll.u32 %s1678_s26, 4  ;;  %p1626_p8 = scmp.ne.s32.totalorder %s1815_s1, %s1625_s30  ;;  %s29_s27 = int_to_ptr.vmem [resolvable:$true] %s28_s27 }
  0x15   :  { %p1629_p9 = scmp.lt.u32.totalorder %s1625_s30, %s1815_s1 }
  0x17   :  { %p1631_p10 = pnand %p1629_p9, %p1626_p8 }
  0x19   :  { %1634 = shalt.err (!%p1631_p10)
}
  0x1a   :  { %s1635_s8 = scalar_lea.vmem %s29_s27, 1024  ;;  %p1640_p12 = scmp.lt.s32.totalorder %s29_s27, %s29_s27 }
  0x1b   :  { %p1636_p11 = scmp.ne.s32.totalorder %s29_s27, %s1635_s8  ;;  %p1641_p13 = scmp.lt.s32.totalorder %s1635_s8, %s1635_s8 }
  0x1d   :  { %p1642_p0 = por %p1641_p13, %p1640_p12 }
  0x1f   :  { %p1643_p1 = pnand %p1642_p0, %p1636_p11 }
  0x21   :  { %1646 = shalt.err (!%p1643_p1)
}
  0x22   :  { %34 = dma.hbm_to_vmem [thread:$0]  %s1815_s1, 1024, %s29_s27, [#allocation6], %s1676_s22, %s1676_s22, %s1677_s23  }
  0x23   :  { %1669 = dma.done.wait [#allocation3], 4096  }
  0x24   :  { %1670 = vsyncadd [#allocation3], 4294963200 }
  0x25   :  { %1671 = dma.done.wait [#allocation6], 1024  }
  0x26   :  { %1672 = vsyncadd [#allocation6], 4294966272  ;;  %v1563_v0 = vld [vmem:[#allocation5] sm:$0xff]   ;;  %v1564_v1 = vld [vmem:[#allocation5 + $0x8] sm:$0xff]  }
  0x27   :  { %1462 = vmatprep.subr.bf16.mxu0 %v1563_v0  ;;  %1542 = vmatprep.subr.bf16.mxu1 %v1563_v0  ;;  %v1565_v2 = vld [vmem:[#allocation5 + $0x10] sm:$0xff]   ;;  %v1566_v3 = vld [vmem:[#allocation5 + $0x18] sm:$0xff]   ;;  %v1571_v4 = vld [vmem:[#allocation2] sm:$0xff]  }
  0x28   :  { %1463 = vmatpush3.bf16.msra.mxu0 %v1563_v0  ;;  %1550 = vmatpush3.bf16.msra.mxu1 %v1563_v0  ;;  %v1572_v5 = vld [vmem:[#allocation2 + $0x80] sm:$0xff]   ;;  %v1568_v7 = vld [vmem:[#allocation5 + $0x28] sm:$0xff]   ;;  %v1569_v8 = vld [vmem:[#allocation5 + $0x30] sm:$0xff]  }
  0x29   :  { %1464 = vmatprep.subr.bf16.mxu0 %v1564_v1  ;;  %1543 = vmatprep.subr.bf16.mxu1 %v1564_v1  ;;  %v1567_v6 = vld [vmem:[#allocation5 + $0x20] sm:$0xff]   ;;  %v1570_v9 = vld [vmem:[#allocation5 + $0x38] sm:$0xff]   ;;  %v1573_v10 = vld [vmem:[#allocation2 + $0x8] sm:$0xff]  }
  0x2a   :  { %1478 = vmatprep.mubr.bf16.mxu0 %v1571_v4  ;;  %1510 = vmatprep.mubr.bf16.mxu1 %v1572_v5  ;;  %v1574_v11 = vld [vmem:[#allocation2 + $0x88] sm:$0xff]   ;;  %v1575_v12 = vld [vmem:[#allocation2 + $0x10] sm:$0xff]   ;;  %v1577_v14 = vld [vmem:[#allocation2 + $0x18] sm:$0xff]  }
  0x2b   :  { %v1576_v13 = vld [vmem:[#allocation2 + $0x90] sm:$0xff]   ;;  %v1578_v15 = vld [vmem:[#allocation2 + $0x98] sm:$0xff]   ;;  %v1579_v16 = vld [vmem:[#allocation2 + $0x20] sm:$0xff]  }
  0x2c   :  { %1465 = vmatpush3.bf16.msra.mxu0 %v1564_v1  ;;  %1551 = vmatpush3.bf16.msra.mxu1 %v1564_v1  ;;  %v1580_v17 = vld [vmem:[#allocation2 + $0xa0] sm:$0xff]   ;;  %v1581_v18 = vld [vmem:[#allocation2 + $0x28] sm:$0xff]   ;;  %v1583_v20 = vld [vmem:[#allocation2 + $0x30] sm:$0xff]  }
  0x2d   :  { %1466 = vmatprep.subr.bf16.mxu0 %v1565_v2  ;;  %1544 = vmatprep.subr.bf16.mxu1 %v1565_v2  ;;  %v1582_v19 = vld [vmem:[#allocation2 + $0xa8] sm:$0xff]   ;;  %v1584_v21 = vld [vmem:[#allocation2 + $0xb0] sm:$0xff]   ;;  %v1585_v22 = vld [vmem:[#allocation2 + $0x38] sm:$0xff]  }
  0x2e   :  { %v1586_v23 = vld [vmem:[#allocation2 + $0xb8] sm:$0xff]   ;;  %v1587_v24 = vld [vmem:[#allocation2 + $0x40] sm:$0xff]   ;;  %v1589_v26 = vld [vmem:[#allocation2 + $0x48] sm:$0xff]  }
  0x2f   :  { %v1588_v25 = vld [vmem:[#allocation2 + $0xc0] sm:$0xff]   ;;  %v1590_v27 = vld [vmem:[#allocation2 + $0xc8] sm:$0xff]   ;;  %v1591_v28 = vld [vmem:[#allocation2 + $0x50] sm:$0xff]  }
  0x30   :  { %1467 = vmatpush3.bf16.msra.mxu0 %v1565_v2  ;;  %1552 = vmatpush3.bf16.msra.mxu1 %v1565_v2  ;;  %v1592_v29 = vld [vmem:[#allocation2 + $0xd0] sm:$0xff]   ;;  %v1593_v30 = vld [vmem:[#allocation2 + $0x58] sm:$0xff]   ;;  %v1595_v32 = vld [vmem:[#allocation2 + $0x60] sm:$0xff]  }
  0x31   :  { %1468 = vmatprep.subr.bf16.mxu0 %v1566_v3  ;;  %1545 = vmatprep.subr.bf16.mxu1 %v1566_v3  ;;  %v1594_v31 = vld [vmem:[#allocation2 + $0xd8] sm:$0xff]   ;;  %v1596_v33 = vld [vmem:[#allocation2 + $0xe0] sm:$0xff]   ;;  %v1597_v34 = vld [vmem:[#allocation2 + $0x68] sm:$0xff]  }
  0x32   :  { %v1598_v35 = vld [vmem:[#allocation2 + $0xe8] sm:$0xff]   ;;  %v1599_v36 = vld [vmem:[#allocation2 + $0x70] sm:$0xff]   ;;  %v1601_v38 = vld [vmem:[#allocation2 + $0x78] sm:$0xff]  }
  0x33   :  { %v1600_v37 = vld [vmem:[#allocation2 + $0xf0] sm:$0xff]   ;;  %v1602_v39 = vld [vmem:[#allocation2 + $0xf8] sm:$0xff]   ;;  %v1733_v40 = vld [vmem:[%s1816_s2] ss:$0 sm:$0xff]  ;;  %s1679_s2 = smov [#allocation7]  }
  0x34   :  { %1469 = vmatpush3.bf16.msra.mxu0 %v1566_v3  ;;  %1553 = vmatpush3.bf16.msra.mxu1 %v1566_v3  ;;  %s1049_s11 = sshll.u32 %s1679_s2, 4  ;;  %s1050_s11 = int_to_ptr.vmem [resolvable:$true] %s1049_s11 }
  0x35   :  { %1470 = vmatprep.subr.bf16.mxu0 %v1567_v6  ;;  %1546 = vmatprep.subr.bf16.mxu1 %v1567_v6  ;;  %s1647_s12 = scalar_lea.vmem %s1050_s11, 4096  ;;  %p1652_p3 = scmp.lt.s32.totalorder %s1050_s11, %s1050_s11 }
  0x36   :  { %p1648_p2 = scmp.ne.s32.totalorder %s1050_s11, %s1647_s12  ;;  %p1653_p4 = scmp.lt.s32.totalorder %s1647_s12, %s1647_s12 }
  0x38   :  { %1471 = vmatpush3.bf16.msra.mxu0 %v1567_v6  ;;  %1554 = vmatpush3.bf16.msra.mxu1 %v1567_v6  ;;  %p1654_p5 = por %p1653_p4, %p1652_p3 }
  0x39   :  { %1472 = vmatprep.subr.bf16.mxu0 %v1568_v7  ;;  %1547 = vmatprep.subr.bf16.mxu1 %v1568_v7 }
  0x3a   :  { %p1655_p6 = pnand %p1654_p5, %p1648_p2 }
  0x3c   :  { %1473 = vmatpush3.bf16.msra.mxu0 %v1568_v7  ;;  %1555 = vmatpush3.bf16.msra.mxu1 %v1568_v7 }
  0x3d   :  { %1474 = vmatprep.subr.bf16.mxu0 %v1569_v8  ;;  %1548 = vmatprep.subr.bf16.mxu1 %v1569_v8 }
  0x40   :  { %1475 = vmatpush3.bf16.msra.mxu0 %v1569_v8  ;;  %1556 = vmatpush3.bf16.msra.mxu1 %v1569_v8 }
  0x41   :  { %1476 = vmatprep.subr.bf16.mxu0 %v1570_v9  ;;  %1549 = vmatprep.subr.bf16.mxu1 %v1570_v9 }
  0x44   :  { %1477 = vmatpush3.bf16.msra.mxu0 %v1570_v9  ;;  %1557 = vmatpush3.bf16.msra.mxu1 %v1570_v9 }
  0x47   :  { %1479 = vmatmul.mubr.bf16.vlgmr.msra.gmra.mrb[0].mxu0 %v1573_v10  ;;  %1511 = vmatmul.mubr.bf16.vlgmr.msra.gmra.mrb[0].mxu1 %v1574_v11 }
  0x48   :  { %1482 = vmatprep.mubr.bf16.mxu0 %v1575_v12  ;;  %1514 = vmatprep.mubr.bf16.mxu1 %v1576_v13 }
  0x4f   :  { %1483 = vmatmul.mubr.bf16.gmra.mrb[4].mxu0 %v1577_v14  ;;  %1515 = vmatmul.mubr.bf16.gmra.mrb[4].mxu1 %v1578_v15 }
  0x50   :  { %1486 = vmatprep.mubr.bf16.mxu0 %v1579_v16  ;;  %1518 = vmatprep.mubr.bf16.mxu1 %v1580_v17 }
  0x57   :  { %1487 = vmatmul.mubr.bf16.gmra.mrb[8].mxu0 %v1581_v18  ;;  %1519 = vmatmul.mubr.bf16.gmra.mrb[8].mxu1 %v1582_v19 }
  0x58   :  { %1490 = vmatprep.mubr.bf16.mxu0 %v1583_v20  ;;  %1522 = vmatprep.mubr.bf16.mxu1 %v1584_v21 }
  0x5f   :  { %1491 = vmatmul.mubr.bf16.gmra.mrb[12].mxu0 %v1585_v22  ;;  %1523 = vmatmul.mubr.bf16.gmra.mrb[12].mxu1 %v1586_v23 }
  0x60   :  { %1494 = vmatprep.mubr.bf16.mxu0 %v1587_v24  ;;  %1526 = vmatprep.mubr.bf16.mxu1 %v1588_v25 }
  0x67   :  { %1495 = vmatmul.mubr.bf16.gmra.mrb[16].mxu0 %v1589_v26  ;;  %1527 = vmatmul.mubr.bf16.gmra.mrb[16].mxu1 %v1590_v27 }
  0x68   :  { %1498 = vmatprep.mubr.bf16.mxu0 %v1591_v28  ;;  %1530 = vmatprep.mubr.bf16.mxu1 %v1592_v29 }
  0x6f   :  { %1499 = vmatmul.mubr.bf16.gmra.mrb[20].mxu0 %v1593_v30  ;;  %1531 = vmatmul.mubr.bf16.gmra.mrb[20].mxu1 %v1594_v31 }
  0x70   :  { %1502 = vmatprep.mubr.bf16.mxu0 %v1595_v32  ;;  %1534 = vmatprep.mubr.bf16.mxu1 %v1596_v33 }
  0x77   :  { %1503 = vmatmul.mubr.bf16.gmra.mrb[24].mxu0 %v1597_v34  ;;  %1535 = vmatmul.mubr.bf16.gmra.mrb[24].mxu1 %v1598_v35 }
  0x78   :  { %1506 = vmatprep.mubr.bf16.mxu0 %v1599_v36  ;;  %1538 = vmatprep.mubr.bf16.mxu1 %v1600_v37 }
  0x7f   :  { %1507 = vmatmul.mubr.bf16.gmra.mrb[28].mxu0 %v1601_v38  ;;  %1539 = vmatmul.mubr.bf16.gmra.mrb[28].mxu1 %v1602_v39 }
 0x11a   :  { %v1480_v41 = vpop.f32.mrb[0].mxu0  ;;  %v1512_v42 = vpop.f32.mrb[0].mxu1 }
 0x11b   :  { %v414_v43 = vadd.f32 %v1480_v41, %v1733_v40  ;;  %v542_v44 = vadd.f32 %v1512_v42, %v1733_v40  ;;  %v405_v45 = vpop.f32.mrb[1].mxu0  ;;  %v533_v46 = vpop.f32.mrb[1].mxu1 }
 0x11c   :  { %v406_v47 = vadd.f32 %v1733_v40, %v405_v45  ;;  %v534_v48 = vadd.f32 %v1733_v40, %v533_v46  ;;  %v1481_v49 = vpop.f32.mrb[2].mxu0  ;;  %v1513_v50 = vpop.f32.mrb[2].mxu1 }
 0x11d   :  { %v417_v51 = vadd.f32 %v1481_v49, %v1733_v40  ;;  %v545_v52 = vadd.f32 %v1513_v50, %v1733_v40  ;;  %v408_v53 = vpop.f32.mrb[3].mxu0  ;;  %v536_v54 = vpop.f32.mrb[3].mxu1  ;;  %v662_v57 = vmax.f32 %v414_v43, 0.0  ;;  %v694_v58 = vmax.f32 %v542_v44, 0.0 }
 0x11e   :  { %v409_v55 = vadd.f32 %v1733_v40, %v408_v53  ;;  %v537_v56 = vadd.f32 %v1733_v40, %v536_v54  ;;  %v660_v61 = vmax.f32 %v406_v47, 0.0  ;;  %v692_v62 = vmax.f32 %v534_v48, 0.0 }
 0x11f   :  { %v663_v59 = vmax.f32 %v417_v51, 0.0  ;;  %v695_v60 = vmax.f32 %v545_v52, 0.0 }
 0x120   :  { %v661_v63 = vmax.f32 %v409_v55, 0.0  ;;  %v693_v0 = vmax.f32 %v537_v56, 0.0 }
 0x121   :  { %v1239_v1 = vpack.c.bf16 %v663_v59, %v662_v57  ;;  %v1319_v2 = vpack.c.bf16 %v695_v60, %v694_v58 }
 0x122   :  { %v1234_v3 = vpack.c.bf16 %v661_v63, %v660_v61  ;;  %v1314_v4 = vpack.c.bf16 %v693_v0, %v692_v62  ;;  %v1484_v5 = vpop.f32.mrb[4].mxu0  ;;  %v1516_v6 = vpop.f32.mrb[4].mxu1 }
 0x123   :  { %1391 = vst [vmem:[#allocation7 + $0x8] sm:$0xff] %v1239_v1   ;;  %1407 = vst [vmem:[#allocation7 + $0x88] sm:$0xff] %v1319_v2   ;;  %v430_v7 = vadd.f32 %v1484_v5, %v1733_v40  ;;  %v558_v8 = vadd.f32 %v1516_v6, %v1733_v40  ;;  %v421_v9 = vpop.f32.mrb[5].mxu0  ;;  %v549_v10 = vpop.f32.mrb[5].mxu1 }
 0x124   :  { %1235 = vst [vmem:[#allocation7] sm:$0xff] %v1234_v3   ;;  %1406 = vst [vmem:[#allocation7 + $0x80] sm:$0xff] %v1314_v4   ;;  %v422_v11 = vadd.f32 %v1733_v40, %v421_v9  ;;  %v550_v12 = vadd.f32 %v1733_v40, %v549_v10  ;;  %v1485_v13 = vpop.f32.mrb[6].mxu0  ;;  %v1517_v14 = vpop.f32.mrb[6].mxu1 }
 0x125   :  { %v433_v15 = vadd.f32 %v1485_v13, %v1733_v40  ;;  %v561_v16 = vadd.f32 %v1517_v14, %v1733_v40  ;;  %v424_v17 = vpop.f32.mrb[7].mxu0  ;;  %v552_v18 = vpop.f32.mrb[7].mxu1  ;;  %v666_v21 = vmax.f32 %v430_v7, 0.0  ;;  %v698_v22 = vmax.f32 %v558_v8, 0.0 }
 0x126   :  { %v425_v19 = vadd.f32 %v1733_v40, %v424_v17  ;;  %v553_v20 = vadd.f32 %v1733_v40, %v552_v18  ;;  %v664_v25 = vmax.f32 %v422_v11, 0.0  ;;  %v696_v26 = vmax.f32 %v550_v12, 0.0 }
 0x127   :  { %v667_v23 = vmax.f32 %v433_v15, 0.0  ;;  %v699_v24 = vmax.f32 %v561_v16, 0.0 }
 0x128   :  { %v665_v27 = vmax.f32 %v425_v19, 0.0  ;;  %v697_v28 = vmax.f32 %v553_v20, 0.0 }
 0x129   :  { %v1249_v29 = vpack.c.bf16 %v667_v23, %v666_v21  ;;  %v1329_v30 = vpack.c.bf16 %v699_v24, %v698_v22 }
 0x12a   :  { %v1244_v31 = vpack.c.bf16 %v665_v27, %v664_v25  ;;  %v1324_v32 = vpack.c.bf16 %v697_v28, %v696_v26  ;;  %v1488_v33 = vpop.f32.mrb[8].mxu0  ;;  %v1520_v34 = vpop.f32.mrb[8].mxu1 }
 0x12b   :  { %1393 = vst [vmem:[#allocation7 + $0x18] sm:$0xff] %v1249_v29   ;;  %1409 = vst [vmem:[#allocation7 + $0x98] sm:$0xff] %v1329_v30   ;;  %v446_v35 = vadd.f32 %v1488_v33, %v1733_v40  ;;  %v574_v36 = vadd.f32 %v1520_v34, %v1733_v40  ;;  %v437_v37 = vpop.f32.mrb[9].mxu0  ;;  %v565_v38 = vpop.f32.mrb[9].mxu1 }
 0x12c   :  { %1392 = vst [vmem:[#allocation7 + $0x10] sm:$0xff] %v1244_v31   ;;  %1408 = vst [vmem:[#allocation7 + $0x90] sm:$0xff] %v1324_v32   ;;  %v438_v39 = vadd.f32 %v1733_v40, %v437_v37  ;;  %v566_v41 = vadd.f32 %v1733_v40, %v565_v38  ;;  %v1489_v42 = vpop.f32.mrb[10].mxu0  ;;  %v1521_v43 = vpop.f32.mrb[10].mxu1 }
 0x12d   :  { %v449_v44 = vadd.f32 %v1489_v42, %v1733_v40  ;;  %v577_v45 = vadd.f32 %v1521_v43, %v1733_v40  ;;  %v440_v46 = vpop.f32.mrb[11].mxu0  ;;  %v568_v47 = vpop.f32.mrb[11].mxu1  ;;  %v670_v50 = vmax.f32 %v446_v35, 0.0  ;;  %v702_v51 = vmax.f32 %v574_v36, 0.0 }
 0x12e   :  { %v441_v48 = vadd.f32 %v1733_v40, %v440_v46  ;;  %v569_v49 = vadd.f32 %v1733_v40, %v568_v47  ;;  %v668_v54 = vmax.f32 %v438_v39, 0.0  ;;  %v700_v55 = vmax.f32 %v566_v41, 0.0 }
 0x12f   :  { %v671_v52 = vmax.f32 %v449_v44, 0.0  ;;  %v703_v53 = vmax.f32 %v577_v45, 0.0 }
 0x130   :  { %v669_v56 = vmax.f32 %v441_v48, 0.0  ;;  %v701_v57 = vmax.f32 %v569_v49, 0.0 }
 0x131   :  { %v1259_v58 = vpack.c.bf16 %v671_v52, %v670_v50  ;;  %v1339_v59 = vpack.c.bf16 %v703_v53, %v702_v51 }
 0x132   :  { %v1254_v60 = vpack.c.bf16 %v669_v56, %v668_v54  ;;  %v1334_v61 = vpack.c.bf16 %v701_v57, %v700_v55  ;;  %v1492_v62 = vpop.f32.mrb[12].mxu0  ;;  %v1524_v63 = vpop.f32.mrb[12].mxu1 }
 0x133   :  { %1395 = vst [vmem:[#allocation7 + $0x28] sm:$0xff] %v1259_v58   ;;  %1411 = vst [vmem:[#allocation7 + $0xa8] sm:$0xff] %v1339_v59   ;;  %v462_v0 = vadd.f32 %v1492_v62, %v1733_v40  ;;  %v590_v1 = vadd.f32 %v1524_v63, %v1733_v40  ;;  %v453_v2 = vpop.f32.mrb[13].mxu0  ;;  %v581_v3 = vpop.f32.mrb[13].mxu1 }
 0x134   :  { %1394 = vst [vmem:[#allocation7 + $0x20] sm:$0xff] %v1254_v60   ;;  %1410 = vst [vmem:[#allocation7 + $0xa0] sm:$0xff] %v1334_v61   ;;  %v454_v4 = vadd.f32 %v1733_v40, %v453_v2  ;;  %v582_v5 = vadd.f32 %v1733_v40, %v581_v3  ;;  %v1493_v6 = vpop.f32.mrb[14].mxu0  ;;  %v1525_v7 = vpop.f32.mrb[14].mxu1 }
 0x135   :  { %v465_v8 = vadd.f32 %v1493_v6, %v1733_v40  ;;  %v593_v9 = vadd.f32 %v1525_v7, %v1733_v40  ;;  %v456_v10 = vpop.f32.mrb[15].mxu0  ;;  %v584_v11 = vpop.f32.mrb[15].mxu1  ;;  %v674_v14 = vmax.f32 %v462_v0, 0.0  ;;  %v706_v15 = vmax.f32 %v590_v1, 0.0 }
 0x136   :  { %v457_v12 = vadd.f32 %v1733_v40, %v456_v10  ;;  %v585_v13 = vadd.f32 %v1733_v40, %v584_v11  ;;  %v672_v18 = vmax.f32 %v454_v4, 0.0  ;;  %v704_v19 = vmax.f32 %v582_v5, 0.0 }
 0x137   :  { %v675_v16 = vmax.f32 %v465_v8, 0.0  ;;  %v707_v17 = vmax.f32 %v593_v9, 0.0 }
 0x138   :  { %v673_v20 = vmax.f32 %v457_v12, 0.0  ;;  %v705_v21 = vmax.f32 %v585_v13, 0.0 }
 0x139   :  { %v1269_v22 = vpack.c.bf16 %v675_v16, %v674_v14  ;;  %v1349_v23 = vpack.c.bf16 %v707_v17, %v706_v15 }
 0x13a   :  { %v1264_v24 = vpack.c.bf16 %v673_v20, %v672_v18  ;;  %v1344_v25 = vpack.c.bf16 %v705_v21, %v704_v19  ;;  %v1496_v26 = vpop.f32.mrb[16].mxu0  ;;  %v1528_v27 = vpop.f32.mrb[16].mxu1 }
 0x13b   :  { %1397 = vst [vmem:[#allocation7 + $0x38] sm:$0xff] %v1269_v22   ;;  %1413 = vst [vmem:[#allocation7 + $0xb8] sm:$0xff] %v1349_v23   ;;  %v478_v28 = vadd.f32 %v1496_v26, %v1733_v40  ;;  %v606_v29 = vadd.f32 %v1528_v27, %v1733_v40  ;;  %v469_v30 = vpop.f32.mrb[17].mxu0  ;;  %v597_v31 = vpop.f32.mrb[17].mxu1 }
 0x13c   :  { %1396 = vst [vmem:[#allocation7 + $0x30] sm:$0xff] %v1264_v24   ;;  %1412 = vst [vmem:[#allocation7 + $0xb0] sm:$0xff] %v1344_v25   ;;  %v470_v32 = vadd.f32 %v1733_v40, %v469_v30  ;;  %v598_v33 = vadd.f32 %v1733_v40, %v597_v31  ;;  %v1497_v34 = vpop.f32.mrb[18].mxu0  ;;  %v1529_v35 = vpop.f32.mrb[18].mxu1 }
 0x13d   :  { %v481_v36 = vadd.f32 %v1497_v34, %v1733_v40  ;;  %v609_v37 = vadd.f32 %v1529_v35, %v1733_v40  ;;  %v472_v38 = vpop.f32.mrb[19].mxu0  ;;  %v600_v39 = vpop.f32.mrb[19].mxu1  ;;  %v678_v43 = vmax.f32 %v478_v28, 0.0  ;;  %v710_v44 = vmax.f32 %v606_v29, 0.0 }
 0x13e   :  { %v473_v41 = vadd.f32 %v1733_v40, %v472_v38  ;;  %v601_v42 = vadd.f32 %v1733_v40, %v600_v39  ;;  %v676_v47 = vmax.f32 %v470_v32, 0.0  ;;  %v708_v48 = vmax.f32 %v598_v33, 0.0 }
 0x13f   :  { %v679_v45 = vmax.f32 %v481_v36, 0.0  ;;  %v711_v46 = vmax.f32 %v609_v37, 0.0 }
 0x140   :  { %v677_v49 = vmax.f32 %v473_v41, 0.0  ;;  %v709_v50 = vmax.f32 %v601_v42, 0.0 }
 0x141   :  { %v1279_v51 = vpack.c.bf16 %v679_v45, %v678_v43  ;;  %v1359_v52 = vpack.c.bf16 %v711_v46, %v710_v44 }
 0x142   :  { %v1274_v53 = vpack.c.bf16 %v677_v49, %v676_v47  ;;  %v1354_v54 = vpack.c.bf16 %v709_v50, %v708_v48  ;;  %v1500_v55 = vpop.f32.mrb[20].mxu0  ;;  %v1532_v56 = vpop.f32.mrb[20].mxu1 }
 0x143   :  { %1399 = vst [vmem:[#allocation7 + $0x48] sm:$0xff] %v1279_v51   ;;  %1415 = vst [vmem:[#allocation7 + $0xc8] sm:$0xff] %v1359_v52   ;;  %v494_v57 = vadd.f32 %v1500_v55, %v1733_v40  ;;  %v622_v58 = vadd.f32 %v1532_v56, %v1733_v40  ;;  %v485_v59 = vpop.f32.mrb[21].mxu0  ;;  %v613_v60 = vpop.f32.mrb[21].mxu1 }
 0x144   :  { %1398 = vst [vmem:[#allocation7 + $0x40] sm:$0xff] %v1274_v53   ;;  %1414 = vst [vmem:[#allocation7 + $0xc0] sm:$0xff] %v1354_v54   ;;  %v486_v61 = vadd.f32 %v1733_v40, %v485_v59  ;;  %v614_v62 = vadd.f32 %v1733_v40, %v613_v60  ;;  %v1501_v63 = vpop.f32.mrb[22].mxu0  ;;  %v1533_v0 = vpop.f32.mrb[22].mxu1 }
 0x145   :  { %v497_v1 = vadd.f32 %v1501_v63, %v1733_v40  ;;  %v625_v2 = vadd.f32 %v1533_v0, %v1733_v40  ;;  %v488_v3 = vpop.f32.mrb[23].mxu0  ;;  %v616_v4 = vpop.f32.mrb[23].mxu1  ;;  %v682_v7 = vmax.f32 %v494_v57, 0.0  ;;  %v714_v8 = vmax.f32 %v622_v58, 0.0 }
 0x146   :  { %v489_v5 = vadd.f32 %v1733_v40, %v488_v3  ;;  %v617_v6 = vadd.f32 %v1733_v40, %v616_v4  ;;  %v680_v11 = vmax.f32 %v486_v61, 0.0  ;;  %v712_v12 = vmax.f32 %v614_v62, 0.0 }
 0x147   :  { %v683_v9 = vmax.f32 %v497_v1, 0.0  ;;  %v715_v10 = vmax.f32 %v625_v2, 0.0 }
 0x148   :  { %v681_v13 = vmax.f32 %v489_v5, 0.0  ;;  %v713_v14 = vmax.f32 %v617_v6, 0.0 }
 0x149   :  { %v1289_v15 = vpack.c.bf16 %v683_v9, %v682_v7  ;;  %v1369_v16 = vpack.c.bf16 %v715_v10, %v714_v8 }
 0x14a   :  { %v1284_v17 = vpack.c.bf16 %v681_v13, %v680_v11  ;;  %v1364_v18 = vpack.c.bf16 %v713_v14, %v712_v12  ;;  %v1504_v19 = vpop.f32.mrb[24].mxu0  ;;  %v1536_v20 = vpop.f32.mrb[24].mxu1 }
 0x14b   :  { %1401 = vst [vmem:[#allocation7 + $0x58] sm:$0xff] %v1289_v15   ;;  %1417 = vst [vmem:[#allocation7 + $0xd8] sm:$0xff] %v1369_v16   ;;  %v510_v21 = vadd.f32 %v1504_v19, %v1733_v40  ;;  %v638_v22 = vadd.f32 %v1536_v20, %v1733_v40  ;;  %v501_v23 = vpop.f32.mrb[25].mxu0  ;;  %v629_v24 = vpop.f32.mrb[25].mxu1 }
 0x14c   :  { %1400 = vst [vmem:[#allocation7 + $0x50] sm:$0xff] %v1284_v17   ;;  %1416 = vst [vmem:[#allocation7 + $0xd0] sm:$0xff] %v1364_v18   ;;  %v502_v25 = vadd.f32 %v1733_v40, %v501_v23  ;;  %v630_v26 = vadd.f32 %v1733_v40, %v629_v24  ;;  %v1505_v27 = vpop.f32.mrb[26].mxu0  ;;  %v1537_v28 = vpop.f32.mrb[26].mxu1 }
 0x14d   :  { %v513_v29 = vadd.f32 %v1505_v27, %v1733_v40  ;;  %v641_v30 = vadd.f32 %v1537_v28, %v1733_v40  ;;  %v504_v31 = vpop.f32.mrb[27].mxu0  ;;  %v632_v32 = vpop.f32.mrb[27].mxu1  ;;  %v686_v35 = vmax.f32 %v510_v21, 0.0  ;;  %v718_v36 = vmax.f32 %v638_v22, 0.0 }
 0x14e   :  { %v505_v33 = vadd.f32 %v1733_v40, %v504_v31  ;;  %v633_v34 = vadd.f32 %v1733_v40, %v632_v32  ;;  %v684_v39 = vmax.f32 %v502_v25, 0.0  ;;  %v716_v41 = vmax.f32 %v630_v26, 0.0 }
 0x14f   :  { %v687_v37 = vmax.f32 %v513_v29, 0.0  ;;  %v719_v38 = vmax.f32 %v641_v30, 0.0 }
 0x150   :  { %v685_v42 = vmax.f32 %v505_v33, 0.0  ;;  %v717_v43 = vmax.f32 %v633_v34, 0.0 }
 0x151   :  { %v1299_v44 = vpack.c.bf16 %v687_v37, %v686_v35  ;;  %v1379_v45 = vpack.c.bf16 %v719_v38, %v718_v36 }
 0x152   :  { %v1294_v46 = vpack.c.bf16 %v685_v42, %v684_v39  ;;  %v1374_v47 = vpack.c.bf16 %v717_v43, %v716_v41  ;;  %v1508_v48 = vpop.f32.mrb[28].mxu0  ;;  %v1540_v49 = vpop.f32.mrb[28].mxu1 }
 0x153   :  { %1403 = vst [vmem:[#allocation7 + $0x68] sm:$0xff] %v1299_v44   ;;  %1419 = vst [vmem:[#allocation7 + $0xe8] sm:$0xff] %v1379_v45   ;;  %v526_v50 = vadd.f32 %v1508_v48, %v1733_v40  ;;  %v654_v51 = vadd.f32 %v1540_v49, %v1733_v40  ;;  %v517_v52 = vpop.f32.mrb[29].mxu0  ;;  %v645_v53 = vpop.f32.mrb[29].mxu1 }
 0x154   :  { %1402 = vst [vmem:[#allocation7 + $0x60] sm:$0xff] %v1294_v46   ;;  %1418 = vst [vmem:[#allocation7 + $0xe0] sm:$0xff] %v1374_v47   ;;  %v518_v54 = vadd.f32 %v1733_v40, %v517_v52  ;;  %v646_v55 = vadd.f32 %v1733_v40, %v645_v53  ;;  %v1509_v56 = vpop.f32.mrb[30].mxu0  ;;  %v1541_v57 = vpop.f32.mrb[30].mxu1 }
 0x155   :  { %v529_v58 = vadd.f32 %v1509_v56, %v1733_v40  ;;  %v657_v59 = vadd.f32 %v1541_v57, %v1733_v40  ;;  %v520_v60 = vpop.f32.mrb[31].mxu0  ;;  %v648_v61 = vpop.f32.mrb[31].mxu1  ;;  %v690_v0 = vmax.f32 %v526_v50, 0.0  ;;  %v722_v1 = vmax.f32 %v654_v51, 0.0 }
 0x156   :  { %v521_v62 = vadd.f32 %v1733_v40, %v520_v60  ;;  %v649_v63 = vadd.f32 %v1733_v40, %v648_v61  ;;  %v688_v4 = vmax.f32 %v518_v54, 0.0  ;;  %v720_v5 = vmax.f32 %v646_v55, 0.0 }
 0x157   :  { %v691_v2 = vmax.f32 %v529_v58, 0.0  ;;  %v723_v3 = vmax.f32 %v657_v59, 0.0 }
 0x158   :  { %v689_v6 = vmax.f32 %v521_v62, 0.0  ;;  %v721_v7 = vmax.f32 %v649_v63, 0.0 }
 0x159   :  { %v1309_v8 = vpack.c.bf16 %v691_v2, %v690_v0  ;;  %v1389_v9 = vpack.c.bf16 %v723_v3, %v722_v1 }
 0x15a   :  { %v1304_v10 = vpack.c.bf16 %v689_v6, %v688_v4  ;;  %v1384_v11 = vpack.c.bf16 %v721_v7, %v720_v5 }
 0x15b   :  { %1405 = vst [vmem:[#allocation7 + $0x78] sm:$0xff] %v1309_v8   ;;  %1421 = vst [vmem:[#allocation7 + $0xf8] sm:$0xff] %v1389_v9  }
 0x15c   :  { %1404 = vst [vmem:[#allocation7 + $0x70] sm:$0xff] %v1304_v10   ;;  %1420 = vst [vmem:[#allocation7 + $0xf0] sm:$0xff] %v1384_v11  }
 0x15d   :  { %1658 = shalt.err (!%p1655_p6)
}
 0x15e   :  { %s1659_s15 = scalar_lea.hbm %s1817_s3, 4096 }
 0x15f   :  { %p1660_p7 = scmp.ne.s32.totalorder %s1817_s3, %s1659_s15  ;;  %p1663_p8 = scmp.lt.u32.totalorder %s1659_s15, %s1817_s3 }
 0x161   :  { %p1665_p9 = pnand %p1663_p8, %p1660_p7 }
 0x163   :  { %1668 = shalt.err (!%p1665_p9)
}
 0x164   :  { %1055 = dma.vmem_to_hbm [thread:$0]  %s1050_s11, 4096, %s1817_s3, [#allocation4], %s1676_s22, %s1676_s22, %s1677_s23  }
 0x165   :  { %1673 = dma.done.wait [#allocation4], 4096  }
 0x166   :  { %1674 = vsyncadd [#allocation4], 4294963200 }
 0x167   :  { %1059 = vsyncpa [#allocation3], 1 }
 0x168   :  { %1060 = vsyncpa [#allocation6], 1 }
 0x169   :  { %1061 = vsyncpa [#allocation4], 1 }

</bundles_post_ra>
